<compile_context>
chip_gen: v7x
topology: tpu7x:2x2x1
jax: 0.10.0
libtpu: 0.0.40
codegen_flags: <defaults>
</compile_context>

<pallas_src>
import functools

import jax
import jax.numpy as jnp
from jax.experimental import pallas as pl
from jax.experimental.pallas import tpu as pltpu


def _round_up(x: int, m: int) -> int:
    return ((x + m - 1) // m) * m


# ---------------------------------------------------------------------------
# Kernels
# ---------------------------------------------------------------------------

def _linear_kernel_single_k(x_ref, w_ref, b_ref, o_ref):
    # Whole K reduction in one block: no accumulator scratch, no pl.when.
    acc = jnp.dot(x_ref[...], w_ref[...], preferred_element_type=jnp.float32)
    o_ref[...] = (acc + b_ref[...]).astype(o_ref.dtype)


def _linear_kernel_multi_k(x_ref, w_ref, b_ref, o_ref, acc_ref):
    k = pl.program_id(2)

    @pl.when(k == 0)
    def _init():
        # Fold the bias into the accumulator initialization (once per tile).
        acc_ref[...] = jnp.broadcast_to(b_ref[...], acc_ref.shape)

    acc_ref[...] += jnp.dot(
        x_ref[...], w_ref[...], preferred_element_type=jnp.float32
    )

    @pl.when(k == pl.num_programs(2) - 1)
    def _finalize():
        o_ref[...] = acc_ref[...].astype(o_ref.dtype)


# ---------------------------------------------------------------------------
# One-time parameter setup: transpose + pad W and b, pick N/K tiles.
# ---------------------------------------------------------------------------

def init_linear_params(w, b, *, param_dtype=jnp.float32, tn_cap=512, tk_cap=2048):
    """w: [OUT, IN] (torch nn.Linear layout), b: [OUT].

    Returns pre-transposed / pre-padded parameters plus static tiling meta.
    All weight padding happens exactly once here, never per forward call.
    """
    OUT, IN = w.shape
    assert b.shape == (OUT,)

    # Lane-dense N tile.  If OUT permits, force >= 2 N blocks so both v7x
    # TensorCores get work on the "parallel" axes.
    out128 = _round_up(OUT, 128)
    tn = min(tn_cap, out128)
    if out128 >= 256 and out128 // tn < 2:
        tn = _round_up(out128 // 2, 128)

    in128 = _round_up(IN, 128)
    tk = min(tk_cap, in128)

    OUTp = _round_up(OUT, tn)
    INp = _round_up(IN, tk)

    w_t = jnp.asarray(w).T  # [IN, OUT], transposed once at setup time
    w_p = jnp.pad(w_t, ((0, INp - IN), (0, OUTp - OUT))).astype(param_dtype)
    # Bias kept in f32 (tiny) so accumulation/init stays exact.
    b_p = jnp.pad(jnp.asarray(b, jnp.float32), (0, OUTp - OUT)).reshape(1, OUTp)

    return dict(w_p=w_p, b_p=b_p, out_features=OUT, in_features=IN, tn=tn, tk=tk)


# ---------------------------------------------------------------------------
# Per-call forward
# ---------------------------------------------------------------------------

@functools.partial(jax.jit, static_argnames=("out_features", "tn", "tk"))
def _linear_pallas(x, w_p, b_p, *, out_features, tn, tk):
    B, IN = x.shape
    INp, OUTp = w_p.shape
    assert IN <= INp

    tm = min(512, _round_up(B, 8))
    Bp = _round_up(B, tm)

    # Only x is padded per call; it is also cast to the weight streaming dtype
    # so the MXU runs at bf16 rate when bf16 params are used.
    xp = x
    if Bp != B or INp != IN:
        xp = jnp.pad(x, ((0, Bp - B), (0, INp - IN)))
    xp = xp.astype(w_p.dtype)

    n_m, n_n, n_k = Bp // tm, OUTp // tn, INp // tk
    out_dtype = x.dtype
    item_w = jnp.dtype(w_p.dtype).itemsize
    item_o = jnp.dtype(out_dtype).itemsize

    cost = pl.CostEstimate(
        flops=2 * Bp * INp * OUTp,
        transcendentals=0,
        bytes_accessed=(Bp * INp * item_w + INp * OUTp * item_w
                        + OUTp * 4 + Bp * OUTp * item_o),
    )

    # Explicit VMEM budget: double-buffered input/output tiles (+ accumulator
    # when the K axis is non-degenerate), with floor/ceiling that are safe on
    # v5e (16 MiB scoped default) and v7x (64 MiB physical).
    vmem_tiles = 2 * (tm * tk * item_w + tk * tn * item_w + tn * 4 + tm * tn * item_o)
    if n_k > 1:
        vmem_tiles += tm * tn * 4
    vmem_limit = int(min(48 * 1024 * 1024, max(2 * vmem_tiles, 16 * 1024 * 1024)))

    if n_k == 1:
        yp = pl.pallas_call(
            _linear_kernel_single_k,
            out_shape=jax.ShapeDtypeStruct((Bp, OUTp), out_dtype),
            grid_spec=pltpu.PrefetchScalarGridSpec(
                num_scalar_prefetch=0,
                grid=(n_m, n_n),
                in_specs=[
                    pl.BlockSpec((tm, tk), lambda i, j: (i, 0)),   # x tile
                    pl.BlockSpec((tk, tn), lambda i, j: (0, j)),   # W^T tile
                    pl.BlockSpec((1, tn), lambda i, j: (0, j)),    # bias tile
                ],
                out_specs=pl.BlockSpec((tm, tn), lambda i, j: (i, j)),
            ),
            compiler_params=pltpu.CompilerParams(
                dimension_semantics=("parallel", "parallel"),
                vmem_limit_bytes=vmem_limit,
            ),
            cost_estimate=cost,
        )(xp, w_p, b_p)
    else:
        yp = pl.pallas_call(
            _linear_kernel_multi_k,
            out_shape=jax.ShapeDtypeStruct((Bp, OUTp), out_dtype),
            grid_spec=pltpu.PrefetchScalarGridSpec(
                num_scalar_prefetch=0,
                grid=(n_m, n_n, n_k),
                in_specs=[
                    pl.BlockSpec((tm, tk), lambda i, j, k: (i, k)),
                    pl.BlockSpec((tk, tn), lambda i, j, k: (k, j)),
                    pl.BlockSpec((1, tn), lambda i, j, k: (0, j)),
                ],
                out_specs=pl.BlockSpec((tm, tn), lambda i, j, k: (i, j)),
                scratch_shapes=[pltpu.VMEM((tm, tn), jnp.float32)],
            ),
            compiler_params=pltpu.CompilerParams(
                dimension_semantics=("parallel", "parallel", "arbitrary"),
                vmem_limit_bytes=vmem_limit,
            ),
            cost_estimate=cost,
        )(xp, w_p, b_p)

    if Bp == B and OUTp == out_features:
        return yp
    return yp[:B, :out_features]


def linear_apply(params, x):
    """SimpleModel.forward(x) == self.fc(x)."""
    return _linear_pallas(
        x, params["w_p"], params["b_p"],
        out_features=params["out_features"], tn=params["tn"], tk=params["tk"],
    )


# TODO(synk): the surrounding DDP / optimizer / DataLoader training scaffolding
# in the reference file is distributed-training plumbing, not part of forward().

if __name__ == "__main__":
    B, INPUT_SIZE, OUTPUT_SIZE = 8, 32, 16

    key = jax.random.PRNGKey(0)
    kx, kw, kb = jax.random.split(key, 3)

    x = jax.random.normal(kx, (B, INPUT_SIZE), dtype=jnp.float32)
    # Mimic nn.Linear's uniform(-1/sqrt(in), 1/sqrt(in)) init.
    bound = 1.0 / (INPUT_SIZE ** 0.5)
    w = jax.random.uniform(kw, (OUTPUT_SIZE, INPUT_SIZE), jnp.float32, -bound, bound)
    b = jax.random.uniform(kb, (OUTPUT_SIZE,), jnp.float32, -bound, bound)

    y_ref = x @ w.T + b

    # Exact f32 path (tight tolerance).
    params_f32 = init_linear_params(w, b, param_dtype=jnp.float32)
    y = jax.block_until_ready(linear_apply(params_f32, x))
    assert y.shape == y_ref.shape
    assert jnp.allclose(y, y_ref, atol=1e-5, rtol=1e-5), "f32 mismatch vs reference"

    # bf16 weight-streaming path (perf path per review), looser tolerance.
    params_bf16 = init_linear_params(w, b, param_dtype=jnp.bfloat16)
    y16 = jax.block_until_ready(linear_apply(params_bf16, x))
    assert y16.shape == y_ref.shape
    assert jnp.allclose(y16, y_ref, atol=5e-2, rtol=5e-2), "bf16 mismatch vs reference"

    print("KERNEL_OK")
</pallas_src>

<mosaic_0001>
module attributes {stable_mosaic.version = 11 : i64} {
  func.func @_linear_kernel_single_k(%arg0: i32, %arg1: i32, %arg2: memref<8x128xf32, #tpu.memory_space<vmem>>, %arg3: memref<128x128xf32, #tpu.memory_space<vmem>>, %arg4: memref<1x128xf32, #tpu.memory_space<vmem>>, %arg5: memref<8x128xf32, #tpu.memory_space<vmem>>) attributes {dimension_semantics = [#tpu.dimension_semantics<parallel>, #tpu.dimension_semantics<parallel>], iteration_bounds = array<i64: 1, 1>, scalar_prefetch = 0 : i64, scratch_operands = 0 : i64, tpu.core_type = #tpu.core_type<tc>, window_params = [{transform_indices = @transform_0, window_bounds = array<i64: 8, 128>}, {transform_indices = @transform_1, window_bounds = array<i64: 128, 128>}, {transform_indices = @transform_2, window_bounds = array<i64: 1, 128>}, {transform_indices = @transform_3, window_bounds = array<i64: 8, 128>}]} {
    %c0 = arith.constant 0 : index
    %c0_0 = arith.constant 0 : index
    %0 = vector.load %arg2[%c0, %c0_0] : memref<8x128xf32, #tpu.memory_space<vmem>>, vector<8x128xf32>
    %c0_1 = arith.constant 0 : index
    %c0_2 = arith.constant 0 : index
    %1 = vector.load %arg3[%c0_1, %c0_2] : memref<128x128xf32, #tpu.memory_space<vmem>>, vector<128x128xf32>
    %cst = arith.constant dense<0.000000e+00> : vector<8x128xf32>
    %2 = tpu.matmul %0, %1, %cst {dimension_numbers = #tpu.dot_dimension_numbers<[1], [0], [0], [1], [0, 0, 1, 1], [], []>} : vector<8x128xf32>, vector<128x128xf32>, vector<8x128xf32> -> vector<8x128xf32>
    %c0_3 = arith.constant 0 : index
    %c0_4 = arith.constant 0 : index
    %3 = vector.load %arg4[%c0_3, %c0_4] : memref<1x128xf32, #tpu.memory_space<vmem>>, vector<1x128xf32>
    %4 = vector.broadcast %3 : vector<1x128xf32> to vector<8x128xf32>
    %5 = arith.addf %2, %4 : vector<8x128xf32>
    %c0_5 = arith.constant 0 : index
    %c0_6 = arith.constant 0 : index
    %6 = vector.load %arg5[%c0_5, %c0_6] : memref<8x128xf32, #tpu.memory_space<vmem>>, vector<8x128xf32>
    tpu.vector_store %arg5[%c0_5, %c0_6], %5 {strides = array<i32>} : memref<8x128xf32, #tpu.memory_space<vmem>>, vector<8x128xf32>,
    return
  }
  func.func @transform_0(%arg0: i32, %arg1: i32) -> (i32, i32) {
    %c0_i32 = arith.constant 0 : i32
    %c0_i32_0 = arith.constant 0 : i32
    return %arg0, %c0_i32 : i32, i32
  }
  func.func @transform_1(%arg0: i32, %arg1: i32) -> (i32, i32) {
    %c0_i32 = arith.constant 0 : i32
    %c0_i32_0 = arith.constant 0 : i32
    return %c0_i32, %arg1 : i32, i32
  }
  func.func @transform_2(%arg0: i32, %arg1: i32) -> (i32, i32) {
    %c0_i32 = arith.constant 0 : i32
    %c0_i32_0 = arith.constant 0 : i32
    return %c0_i32, %arg1 : i32, i32
  }
  func.func @transform_3(%arg0: i32, %arg1: i32) -> (i32, i32) {
    %c0_i32 = arith.constant 0 : i32
    return %arg0, %arg1 : i32, i32
  }
}

</mosaic_0001>

<bundles_post_ra>
// kernel: _linear_pallas.1
= control target key start
LH: loop header
LB: loop body
LE: loop exit
PB: predicated region body
PF: predicated region fallthrough
CT: control target
= control target key end

     0   :  { %8 = vsyncpa [#allocation3], 0  ;;  %s328_s0 = inlined_call_operand.vmem [shape: f32[8,128], index: 0, kind: input, shape index: {}]   ;;  %s329_s1 = inlined_call_operand.hbm [shape: f32[128,128], index: 1, kind: input, shape index: {}]   ;;  %s330_s2 = inlined_call_operand.vmem [shape: f32[1,128], index: 2, kind: input, shape index: {}]   ;;  %s331_s3 = inlined_call_operand.hbm [shape: f32[8,128], index: 3, kind: output, shape index: {}]  }
   0x1   :  { %9 = vsyncpa [#allocation4], 0  ;;  %s271_s12 = smov [#allocation2]   ;;  %s223_s16 = scalar_lea.hbm %s329_s1, 2048 }
   0x2   :  { %s17_s13 = sshll.u32 %s271_s12, 4  ;;  %p224_p0 = scmp.ne.s32.totalorder %s329_s1, %s223_s16  ;;  %s18_s13 = int_to_ptr.vmem [resolvable:$true] %s17_s13 }
   0x3   :  { %p227_p1 = scmp.lt.u32.totalorder %s223_s16, %s329_s1 }
   0x5   :  { %p229_p2 = pnand %p227_p1, %p224_p0 }
   0x7   :  { %232 = shalt.err (!%p229_p2)
}
   0x8   :  { %s233_s21 = scalar_lea.vmem %s18_s13, 2048  ;;  %p238_p4 = scmp.lt.s32.totalorder %s18_s13, %s18_s13 }
   0x9   :  { %p234_p3 = scmp.ne.s32.totalorder %s18_s13, %s233_s21  ;;  %p239_p5 = scmp.lt.s32.totalorder %s233_s21, %s233_s21 }
   0xb   :  { %p240_p6 = por %p239_p5, %p238_p4 }
   0xd   :  { %p241_p7 = pnand %p240_p6, %p234_p3 }
   0xf   :  { %244 = shalt.err (!%p241_p7)
}
  0x10   :  { %s272_s22 = smov 128   ;;  %s273_s23 = smov 8  }
  0x11   :  { %23 = dma.hbm_to_vmem [thread:$0]  %s329_s1, 2048, %s18_s13, [#allocation3], %s272_s22, %s272_s22, %s273_s23  }
  0x12   :  { %267 = dma.done.wait [#allocation3], 2048  }
  0x13   :  { %268 = vsyncadd [#allocation3], 4294965248  ;;  %v274_v0 = vmov 0.0|0.0   ;;  %vm275_vm0 = vmmov 0   ;;  %v276_v1 = vmov 0.0   ;;  %v30_v2 = vld [vmem:[#allocation2] sm:$0xff] }
  0x14   :  { %192 = vmatprep.subr.bf16.mxu0 %v274_v0  ;;  %189 = vmatprep.mubr.msk.f32.mxu0 %vm275_vm0, %v276_v1  ;;  %v31_v3 = vld [vmem:[#allocation2 + $0x8] sm:$0xff]  ;;  %v32_v4 = vld [vmem:[#allocation2 + $0x10] sm:$0xff]  ;;  %v33_v6 = vld [vmem:[#allocation2 + $0x18] sm:$0xff]  ;;  %s277_s29 = smov [#allocation5]  }
  0x15   :  { %v193_v5 = vpack.c.bf16 %v31_v3, %v30_v2  ;;  %v196_v7 = vpack.c.bf16 %v33_v6, %v32_v4  ;;  %v34_v8 = vld [vmem:[#allocation2 + $0x20] sm:$0xff]  ;;  %v35_v9 = vld [vmem:[#allocation2 + $0x28] sm:$0xff]  ;;  %v36_v11 = vld [vmem:[#allocation2 + $0x30] sm:$0xff]  ;;  %s130_s30 = sshll.u32 %s277_s29, 4  ;;  %s131_s30 = int_to_ptr.vmem [resolvable:$true] %s130_s30 }
  0x16   :  { %v199_v10 = vpack.c.bf16 %v35_v9, %v34_v8  ;;  %v37_v12 = vld [vmem:[#allocation2 + $0x38] sm:$0xff]  ;;  %v38_v14 = vld [vmem:[#allocation2 + $0x40] sm:$0xff]  ;;  %v39_v15 = vld [vmem:[#allocation2 + $0x48] sm:$0xff]  ;;  %s245_s4 = scalar_lea.vmem %s131_s30, 128  ;;  %p250_p9 = scmp.lt.s32.totalorder %s131_s30, %s131_s30 }
  0x17   :  { %194 = vmatpush3.bf16.msra.mxu0 %v193_v5  ;;  %v202_v13 = vpack.c.bf16 %v37_v12, %v36_v11  ;;  %v205_v16 = vpack.c.bf16 %v39_v15, %v38_v14  ;;  %v40_v17 = vld [vmem:[#allocation2 + $0x50] sm:$0xff]  ;;  %v41_v18 = vld [vmem:[#allocation2 + $0x58] sm:$0xff]  ;;  %v42_v20 = vld [vmem:[#allocation2 + $0x60] sm:$0xff]  ;;  %p246_p8 = scmp.ne.s32.totalorder %s131_s30, %s245_s4  ;;  %p251_p10 = scmp.lt.s32.totalorder %s245_s4, %s245_s4 }
  0x18   :  { %195 = vmatprep.subr.bf16.mxu0 %v274_v0  ;;  %v208_v19 = vpack.c.bf16 %v41_v18, %v40_v17  ;;  %v43_v21 = vld [vmem:[#allocation2 + $0x68] sm:$0xff]  ;;  %v44_v23 = vld [vmem:[#allocation2 + $0x70] sm:$0xff]  ;;  %v45_v24 = vld [vmem:[#allocation2 + $0x78] sm:$0xff] }
  0x19   :  { %v211_v22 = vpack.c.bf16 %v43_v21, %v42_v20  ;;  %v214_v25 = vpack.c.bf16 %v45_v24, %v44_v23  ;;  %v29_v26 = vld [vmem:[%s328_s0] sm:$0xff]  ;;  %p252_p11 = por %p251_p10, %p250_p9 }
  0x1a   :  { %v139_v27 = vld [vmem:[%s330_s2] ss:$0 sm:$0xff] }
  0x1b   :  { %197 = vmatpush3.bf16.msra.mxu0 %v196_v7  ;;  %p253_p12 = pnand %p252_p11, %p246_p8 }
  0x1c   :  { %198 = vmatprep.subr.bf16.mxu0 %v274_v0 }
  0x1f   :  { %200 = vmatpush3.bf16.msra.mxu0 %v199_v10 }
  0x20   :  { %201 = vmatprep.subr.bf16.mxu0 %v274_v0 }
  0x23   :  { %203 = vmatpush3.bf16.msra.mxu0 %v202_v13 }
  0x24   :  { %204 = vmatprep.subr.bf16.mxu0 %v274_v0 }
  0x27   :  { %206 = vmatpush3.bf16.msra.mxu0 %v205_v16 }
  0x28   :  { %207 = vmatprep.subr.bf16.mxu0 %v274_v0 }
  0x2b   :  { %209 = vmatpush3.bf16.msra.mxu0 %v208_v19 }
  0x2c   :  { %210 = vmatprep.subr.bf16.mxu0 %v274_v0 }
  0x2f   :  { %212 = vmatpush3.bf16.msra.mxu0 %v211_v22 }
  0x30   :  { %213 = vmatprep.subr.bf16.mxu0 %v274_v0 }
  0x33   :  { %215 = vmatpush3.bf16.msra.mxu0 %v214_v25 }
  0x36   :  { %190 = vmatmul.mubr.f32.vlgmr.msra.gmra.mrb[0].mxu0 %v29_v26 }
 0x109   :  { %v119_v28 = vpop.f32.mrb[0].mxu0 }
 0x10a   :  { %v120_v29 = vadd.f32 %v139_v27, %v119_v28  ;;  %v191_v30 = vpop.f32.mrb[1].mxu0 }
 0x10c   :  { %123 = vst [vmem:[#allocation5] sm:$0xff] %v120_v29 }
 0x10d   :  { %256 = shalt.err (!%p253_p12)
}
 0x10e   :  { %s257_s6 = scalar_lea.hbm %s331_s3, 128 }
 0x10f   :  { %p258_p13 = scmp.ne.s32.totalorder %s331_s3, %s257_s6  ;;  %p261_p0 = scmp.lt.u32.totalorder %s257_s6, %s331_s3 }
 0x111   :  { %p263_p1 = pnand %p261_p0, %p258_p13 }
 0x113   :  { %266 = shalt.err (!%p263_p1)
}
 0x114   :  { %133 = dma.vmem_to_hbm [thread:$0]  %s131_s30, 128, %s331_s3, [#allocation4]  }
 0x115   :  { %269 = dma.done.wait [#allocation4], 128  }
 0x116   :  { %270 = vsyncadd [#allocation4], 4294967168 }
 0x117   :  { %137 = vsyncpa [#allocation3], 1 }
 0x118   :  { %138 = vsyncpa [#allocation4], 1 }

</bundles_post_ra>
